<compile_context>
chip_gen: v5e
topology: v5e:2x2
jax: 0.10.0
libtpu: 0.0.40
codegen_flags: <defaults>
</compile_context>

<pallas_src>
import functools
import jax
import jax.numpy as jnp
from jax.experimental import pallas as pl
from jax.experimental.pallas import tpu as pltpu

LANE = 128
_MAX_COLS = 8192                    # widest lane-dense slab we try
_MAX_FALLBACK_COLS = 16384          # divisor-scan cap for odd totals (VMEM clamp)
_SMALL_BYPASS_BYTES = 256 * 1024    # below this, plain XLA elementwise wins
_MIN_LANE_UTIL = 0.5                # below this lane utilization, use plain jnp


def _activate_kernel(x_ref, o_ref, *, method: str):
    x = x_ref[...]
    if method == "relu":
        y = jnp.maximum(x, jnp.zeros_like(x))
    elif method == "sigmoid":
        # Upcast only when sub-32-bit; exact reciprocal (kernel is DMA-bound,
        # the approximate EUP variant buys nothing and would cost precision).
        xf = x if x.dtype == jnp.float32 else x.astype(jnp.float32)
        y = pl.reciprocal(1.0 + jnp.exp(-xf)).astype(x.dtype)
    elif method == "leaky_relu":
        y = jnp.where(x >= 0, x, x * jnp.asarray(0.02, dtype=x.dtype))
    else:
        raise NotImplementedError("--->%s" % method)
    o_ref[...] = y


def _activate_jnp(x, method):
    """Plain-XLA path: small inputs / pathological sizes."""
    if method == "relu":
        return jnp.maximum(x, jnp.zeros_like(x))
    if method == "sigmoid":
        return jax.nn.sigmoid(x)
    if method == "leaky_relu":
        return jnp.where(x >= 0, x, x * jnp.asarray(0.02, dtype=x.dtype))
    raise NotImplementedError("--->%s" % method)


def _target_block_bytes():
    """Generation-aware block size + detected VMEM capacity (safe fallback)."""
    try:
        vmem_cap = int(pltpu.get_tpu_info().vmem_capacity_bytes)
    except Exception:
        vmem_cap = 64 * 1024 * 1024          # worst case (v7x per-TC VMEM)
    if vmem_cap >= 100 * 1024 * 1024:        # v5e / v6e: 128 MiB physical
        return 6 * 1024 * 1024, vmem_cap     # 86%+ roofline plateau
    return 4 * 1024 * 1024, vmem_cap         # v7x (64 MiB / TC) or unknown


def _choose_cols(total):
    """Pick the lane (last) dim for the 2-D view of the flat data."""
    # Prefer the widest multiple-of-128 divisor -> unmasked, lane-dense stores.
    for c in range(_MAX_COLS, 0, -LANE):
        if total % c == 0:
            return c
    # No multiple-of-128 divisor: best lane-utilization divisor <= cap
    # (cap keeps the (sublane, cols) block bounded in VMEM).
    best, best_util = 1, 1.0 / LANE
    limit = min(total, _MAX_FALLBACK_COLS)
    for cand in range(2, limit + 1):
        if total % cand:
            continue
        util = cand / float(-(-cand // LANE) * LANE)
        if util > best_util or (util == best_util and cand > best):
            best, best_util = cand, util
    return best if best_util >= _MIN_LANE_UTIL else 0


def activate(x: jax.Array, method: str = "relu", *, force_pallas: bool = False,
             donate: bool = False, block_bytes: int | None = None) -> jax.Array:
    """Elementwise activation (relu / sigmoid / leaky_relu) matching Activate."""
    orig_shape = x.shape
    dtype = x.dtype
    total = int(x.size)
    itemsize = jnp.dtype(dtype).itemsize

    if total == 0:
        return x
    if not force_pallas and total * itemsize < _SMALL_BYPASS_BYTES:
        # Tiny tensors: kernel launch + per-grid-step overhead dwarfs one or
        # two vregs of work; XLA fuses this into its neighbours for free.
        return _activate_jnp(x, method)

    cols = _choose_cols(total)
    if cols == 0:
        # Pathological size (no usable divisor): lane-masked stores would
        # dominate, so the plain XLA elementwise is the faster correct choice.
        return _activate_jnp(x, method)

    rows = total // cols
    # Metadata-only reshape of the contiguous data (elementwise op, so any
    # flat regrouping is semantics-preserving; no extra HBM traffic).
    x2d = x.reshape(rows, cols)

    sublane = max(8, 32 // itemsize)          # 8 f32 / 16 bf16 / 32 int8
    padded_cols = -(-cols // LANE) * LANE     # lanes pad to 128 in VMEM
    target_bytes, vmem_cap = _target_block_bytes()
    if block_bytes is not None:
        target_bytes = block_bytes

    row_block = target_bytes // max(1, padded_cols * itemsize)
    row_block = max(sublane, (row_block // sublane) * sublane)
    if row_block >= rows:
        row_block = rows          # full-extent block (exempt from 8-row rule)
    # cdiv grid: Pallas masks the partial last block -> no wrapper padding.
    grid = (pl.cdiv(rows, row_block),)

    # VMEM budget: in + out, double-buffered, plus compiler-scratch headroom;
    # clamped under the physical capacity so v7x (64 MiB/TC) is never exceeded
    # and v5e's 16 MiB scoped default is always lifted.
    block_vmem = row_block * padded_cols * itemsize
    vmem_limit = 4 * block_vmem + (16 << 20)
    vmem_limit = max(24 << 20, min(vmem_limit, vmem_cap - (16 << 20)))

    kernel = functools.partial(_activate_kernel, method=method)
    cost = pl.CostEstimate(
        flops=total,
        transcendentals=total if method == "sigmoid" else 0,
        bytes_accessed=2 * total * itemsize,
    )

    # TODO(synk): on v7x, evaluate dimension_semantics=(pltpu.CORE_PARALLEL,)
    # if a single TensorCore's DMA stream can't saturate ~3.2 TB/s HBM;
    # "parallel" is kept here because it is safe on all generations.
    y2d = pl.pallas_call(
        kernel,
        out_shape=jax.ShapeDtypeStruct((rows, cols), dtype),
        grid_spec=pltpu.PrefetchScalarGridSpec(
            num_scalar_prefetch=0,
            grid=grid,
            in_specs=[pl.BlockSpec((row_block, cols), lambda i: (i, 0))],
            out_specs=pl.BlockSpec((row_block, cols), lambda i: (i, 0)),
        ),
        compiler_params=pltpu.CompilerParams(
            dimension_semantics=("parallel",),
            vmem_limit_bytes=int(vmem_limit),
        ),
        cost_estimate=cost,
        input_output_aliases={0: 0} if donate else {},
    )(x2d)

    return y2d.reshape(orig_shape)


if __name__ == "__main__":
    key = jax.random.PRNGKey(0)
    k0, k1, k2 = jax.random.split(key, 3)

    # NCHW input matching the module's typical use (batch=2, ch=4, 16x16).
    x = jax.random.normal(k0, (2, 4, 16, 16), dtype=jnp.float32)

    out_relu = jax.block_until_ready(activate(x, "relu", force_pallas=True))
    out_sig = jax.block_until_ready(activate(x, "sigmoid", force_pallas=True))
    out_lrelu = jax.block_until_ready(activate(x, "leaky_relu", force_pallas=True))

    assert jnp.allclose(out_relu, jnp.maximum(x, 0.0), atol=1e-6), "relu mismatch"
    assert jnp.allclose(out_sig, jax.nn.sigmoid(x), atol=1e-5), "sigmoid mismatch"
    assert jnp.allclose(out_lrelu, jnp.where(x >= 0, x, 0.02 * x), atol=1e-6), \
        "leaky_relu mismatch"

    # Small-input bypass path (plain fused XLA elementwise).
    out_bypass = jax.block_until_ready(activate(x, "relu"))
    assert jnp.allclose(out_bypass, jnp.maximum(x, 0.0), atol=1e-6), "bypass mismatch"

    # Multi-block grid with a partial (masked) last block: rows=20, row_block=8.
    x_med = jax.random.normal(k1, (5, 4, 64, 128), dtype=jnp.float32)
    out_med = jax.block_until_ready(
        activate(x_med, "leaky_relu", force_pallas=True, block_bytes=64 * 1024))
    assert jnp.allclose(out_med, jnp.where(x_med >= 0, x_med, 0.02 * x_med),
                        atol=1e-6), "multi-block leaky_relu mismatch"

    # In-place aliased output path (input_output_aliases={0: 0}).
    out_dn = jax.block_until_ready(
        activate(x_med, "relu", force_pallas=True, donate=True))
    assert jnp.allclose(out_dn, jnp.maximum(x_med, 0.0), atol=1e-6), "donate mismatch"

    # Odd total (105 elems): divisor-scan fallback (cols=105, lane-masked, correct).
    x_odd = jax.random.normal(k2, (3, 5, 7), dtype=jnp.float32)
    out_odd = jax.block_until_ready(activate(x_odd, "sigmoid", force_pallas=True))
    assert jnp.allclose(out_odd, jax.nn.sigmoid(x_odd), atol=1e-5), \
        "odd-shape sigmoid mismatch"

    # Sub-32-bit dtype (bf16 -> 16-row sublane packing).
    x_bf16 = x.astype(jnp.bfloat16)
    out_bf16 = jax.block_until_ready(activate(x_bf16, "relu", force_pallas=True))
    assert jnp.allclose(out_bf16, jnp.maximum(x_bf16, 0), atol=1e-2), \
        "bf16 relu mismatch"

    print("KERNEL_OK")
</pallas_src>

<mosaic_0001>
module attributes {stable_mosaic.version = 11 : i64} {
  func.func @_activate_kernel(%arg0: i32, %arg1: memref<1x2048xf32, #tpu.memory_space<vmem>>, %arg2: memref<1x2048xf32, #tpu.memory_space<vmem>>) attributes {dimension_semantics = [#tpu.dimension_semantics<parallel>], iteration_bounds = array<i64: 1>, scalar_prefetch = 0 : i64, scratch_operands = 0 : i64, tpu.core_type = #tpu.core_type<tc>, window_params = [{transform_indices = @transform_0, window_bounds = array<i64: 1, 2048>}, {transform_indices = @transform_1, window_bounds = array<i64: 1, 2048>}]} {
    %c0 = arith.constant 0 : index
    %c0_0 = arith.constant 0 : index
    %0 = vector.load %arg1[%c0, %c0_0] : memref<1x2048xf32, #tpu.memory_space<vmem>>, vector<1x2048xf32>
    %cst = arith.constant 0.000000e+00 : f32
    %1 = vector.broadcast %cst : f32 to vector<1x2048xf32>
    %2 = arith.maximumf %0, %1 : vector<1x2048xf32>
    %c0_1 = arith.constant 0 : index
    %c0_2 = arith.constant 0 : index
    %3 = vector.load %arg2[%c0_1, %c0_2] : memref<1x2048xf32, #tpu.memory_space<vmem>>, vector<1x2048xf32>
    tpu.vector_store %arg2[%c0_1, %c0_2], %2 {strides = array<i32>} : memref<1x2048xf32, #tpu.memory_space<vmem>>, vector<1x2048xf32>,
    return
  }
  func.func @transform_0(%arg0: i32) -> (i32, i32) {
    %c0_i32 = arith.constant 0 : i32
    %c0_i32_0 = arith.constant 0 : i32
    return %arg0, %c0_i32 : i32, i32
  }
  func.func @transform_1(%arg0: i32) -> (i32, i32) {
    %c0_i32 = arith.constant 0 : i32
    %c0_i32_0 = arith.constant 0 : i32
    return %arg0, %c0_i32 : i32, i32
  }
}

</mosaic_0001>

<bundles_post_ra>
// kernel: tpu_custom_call.1
= control target key start
LH: loop header
LB: loop body
LE: loop exit
PB: predicated region body
PF: predicated region fallthrough
CT: control target
= control target key end

     0   :  { %6 = vsyncpa [#allocation3], 0  ;;  %s118_s0 = inlined_call_operand.hbm [shape: f32[1,2048], index: 0, kind: input, shape index: {}]   ;;  %s119_s1 = inlined_call_operand.hbm [shape: f32[1,2048], index: 1, kind: output, shape index: {}]  }
   0x1   :  { %7 = vsyncpa [#allocation4], 0  ;;  %s13_s8 = sshll.u32 %s118_s0, 4  ;;  %s100_s9 = smov [#allocation2]   ;;  %s14_s8 = int_to_ptr.hbm [resolvable:$true] %s13_s8 }
   0x2   :  { %s15_s10 = sshll.u32 %s100_s9, 4  ;;  %s16_s10 = int_to_ptr.vmem [resolvable:$true] %s15_s10 }
   0x3   :  { %18 = dma.hbm_to_vmem [thread:$0]  %s14_s8, 256, %s16_s10, [#allocation3]  }
   0x4   :  { %96 = dma.done.wait [#allocation3], 256  }
   0x5   :  { %97 = vsyncadd [#allocation3], 4294967040  ;;  %s101_s11 = smov [#allocation5]   ;;  %s36_s15 = sshll.u32 %s119_s1, 4  ;;  %v23_v0 = vld [vmem:[#allocation2] sm:$0xff]  ;;  %v24_v1 = vld [vmem:[#allocation2 + $0x8] sm:$0xff]  ;;  %s37_s15 = int_to_ptr.hbm [resolvable:$true] %s36_s15 }
   0x6   :  { %s34_s12 = sshll.u32 %s101_s11, 4  ;;  %v25_v2 = vmax.f32 %v23_v0, 0.0  ;;  %v26_v3 = vmax.f32 %v24_v1, 0.0  ;;  %s35_s12 = int_to_ptr.vmem [resolvable:$true] %s34_s12 }
   0x8   :  { %27 = vst [vmem:[#allocation5] sm:$0xff] %v25_v2 }
   0x9   :  { %28 = vst [vmem:[#allocation5 + $0x8] sm:$0xff] %v26_v3 }
   0xa   :  { %39 = dma.vmem_to_hbm [thread:$0]  %s35_s12, 256, %s37_s15, [#allocation4]  }
   0xb   :  { %98 = dma.done.wait [#allocation4], 256  }
   0xc   :  { %99 = vsyncadd [#allocation4], 4294967040 }
   0xd   :  { %44 = vsyncpa [#allocation3], 1 }
   0xe   :  { %45 = vsyncpa [#allocation4], 1 }

</bundles_post_ra>
